<compile_context>
chip_gen: v7x
topology: tpu7x:2x2x1
jax: 0.10.0
libtpu: 0.0.40
codegen_flags: <defaults>
</compile_context>

<pallas_src>
import jax
import jax.numpy as jnp
from jax.experimental import pallas as pl
from jax.experimental.pallas import tpu as pltpu


# --------------------------------------------------------------------------- #
# Kernel factory
# --------------------------------------------------------------------------- #
def _make_fuse_kernel(n_low, rows, W, W2, Cout):
    """out = relu( sum_i (Wl_i @ low_i) + nearest_x2(Wh @ high) + b ), one tile."""

    def kernel(*refs):
        low_refs = refs[:n_low]                     # each (1, Cl_i, t)
        hi_ref   = refs[n_low]                      # (1, Ch, rows*W)   low-res
        wl_refs  = refs[n_low + 1:2 * n_low + 1]    # each (1, Cout, Cl_i)
        wh_ref   = refs[2 * n_low + 1]              # (1, Cout, Ch)
        e_ref    = refs[2 * n_low + 2]              # (W, W2) 0/1 expansion matrix
        b_ref    = refs[2 * n_low + 3]              # (Cout, 1)
        o_ref    = refs[2 * n_low + 4]              # (1, Cout, t)
        hconv    = refs[2 * n_low + 5]              # (Cout, rows*W)   f32 scratch
        hup      = refs[2 * n_low + 6]              # (Cout, rows*2*W2) f32 scratch

        # High path: 1x1 conv at LOW resolution (one MXU dot for the whole tile).
        hconv[...] = jnp.dot(wh_ref[0], hi_ref[0],
                             preferred_element_type=jnp.float32)

        # Nearest-x2 upsample of the (Cout-channel) result, fully in-kernel:
        #   W-repeat = matmul with the 0/1 matrix E (exact in f32),
        #   H-repeat = store each upsampled row into both rows of its pair.
        for r in range(rows):                       # static unroll, rows is small
            row_up = jnp.dot(hconv[:, r * W:(r + 1) * W], e_ref[...],
                             preferred_element_type=jnp.float32)   # (Cout, W2)
            hup[:, (2 * r) * W2:(2 * r + 1) * W2] = row_up
            hup[:, (2 * r + 1) * W2:(2 * r + 2) * W2] = row_up

        # Low path: SE-scaled 1x1 conv, one lane-dense MXU dot per low input.
        acc = jnp.dot(wl_refs[0][0], low_refs[0][0],
                      preferred_element_type=jnp.float32)
        for j in range(1, n_low):
            acc = acc + jnp.dot(wl_refs[j][0], low_refs[j][0],
                                preferred_element_type=jnp.float32)

        acc = acc + hup[...] + b_ref[...].astype(jnp.float32)
        o_ref[0] = jnp.maximum(acc, 0.0).astype(o_ref.dtype)

    return kernel


# --------------------------------------------------------------------------- #
# Tiling helper
# --------------------------------------------------------------------------- #
def _pick_rows(H, W, W2, target_lanes, prefer_split):
    """Low-res rows per tile k.

    Constraints: k | H, and every lane block (out/low: k*2*W2, high: k*W) is
    either a multiple of 128 or the full array extent (k == H).  Since
    k*2*W2 == 4*k*W, (k*W) % 128 == 0 covers all of them.  Prefers the largest
    k whose output tile fits the lane target; falls back to the full extent
    (always legal).  With prefer_split (B == 1 on v7x) keep >= 2 spatial tiles
    when a legal split exists.
    """
    legal = [k for k in range(1, H + 1)
             if H % k == 0 and ((k * W) % 128 == 0 or k == H)]
    fit = [k for k in legal if k * 2 * W2 <= target_lanes]
    k = max(fit) if fit else min(legal)
    if prefer_split and k == H:
        smaller = [x for x in legal if x < H]
        if smaller:
            k = max(smaller)
    return k


# --------------------------------------------------------------------------- #
# Wrapper
# --------------------------------------------------------------------------- #
def fse_forward(high_features, low_features, params, *, target_lanes=8192):
    """high_features: [B, Ch, H, W]; low_features: list of [B, Cl_i, 2H, 2W]."""
    w1, w2, wc, bc = params
    B, Ch, H, W = high_features.shape
    lows = list(low_features)
    n_low = len(lows)
    cls = [int(l.shape[1]) for l in lows]
    H2, W2 = int(lows[0].shape[2]), int(lows[0].shape[3])
    for l in lows:
        assert l.shape[0] == B and l.shape[2] == H2 and l.shape[3] == W2
    # The pool/conv commute trick requires an exact nearest-x2 relationship.
    assert H2 == 2 * H and W2 == 2 * W, "low features must be exactly 2x high"

    Cl = sum(cls)
    C = Ch + Cl
    Cout = wc.shape[0]
    HW, HW2 = H * W, H2 * W2
    dtype = high_features.dtype
    itemsize = jnp.dtype(dtype).itemsize

    # --- squeeze & excite gate (tiny [B, C] work, plain JAX) -----------------
    # mean(nearest_x2(high)) == mean(high), so nothing upsampled is needed, and
    # per-tensor means avoid materializing the channel concat.
    pooled = jnp.concatenate(
        [jnp.mean(high_features, axis=(2, 3))]
        + [jnp.mean(l, axis=(2, 3)) for l in lows], axis=1).astype(jnp.float32)
    hmid = jax.nn.relu(pooled @ w1.T.astype(jnp.float32))            # [B, mid]
    s = jax.nn.sigmoid(hmid @ w2.T.astype(jnp.float32))              # [B, C]

    # Fold the per-channel gate into the 1x1-conv weight: (wc * s) @ feat.
    wc_s = wc[None].astype(jnp.float32) * s[:, None, :]              # [B, Cout, C]
    wch = wc_s[:, :, :Ch].astype(dtype)                              # [B, Cout, Ch]
    wls, off = [], Ch
    for c in cls:
        wls.append(wc_s[:, :, off:off + c].astype(dtype))            # [B, Cout, Cl_i]
        off += c
    bias = bc.reshape(Cout, 1).astype(jnp.float32)

    # Exact 0/1 nearest-x2 expansion matrix along W: E[c, 2c] = E[c, 2c+1] = 1.
    e = (jax.lax.broadcasted_iota(jnp.int32, (W, W2), 1) // 2
         == jax.lax.broadcasted_iota(jnp.int32, (W, W2), 0)).astype(jnp.float32)

    # --- tiling ---------------------------------------------------------------
    rows = _pick_rows(H, W, W2, target_lanes, prefer_split=(B == 1))
    t, t4 = rows * 2 * W2, rows * W          # output / high lane-tile widths
    n_tiles = H // rows                      # == HW2 // t

    high_flat = high_features.reshape(B, Ch, HW)
    low_flats = [l.reshape(B, c, HW2) for l, c in zip(lows, cls)]

    kernel = _make_fuse_kernel(n_low, rows, W, W2, Cout)

    in_specs = (
        [pl.BlockSpec((1, c, t), lambda b, i: (b, 0, i)) for c in cls]
        + [pl.BlockSpec((1, Ch, t4), lambda b, i: (b, 0, i))]
        + [pl.BlockSpec((1, Cout, c), lambda b, i: (b, 0, 0)) for c in cls]
        + [pl.BlockSpec((1, Cout, Ch), lambda b, i: (b, 0, 0)),
           pl.BlockSpec((W, W2), lambda b, i: (0, 0)),
           pl.BlockSpec((Cout, 1), lambda b, i: (0, 0))]
    )

    # Advisory cost for the XLA scheduler: HBM-bound, ~5 flop/byte.
    flops = 2 * B * Cout * (Cl * HW2 + Ch * HW + W * W2 * H)
    bytes_accessed = itemsize * B * (Ch * HW + Cl * HW2 + Cout * HW2 + Cout * C)
    cost = pl.CostEstimate(flops=int(flops), transcendentals=0,
                           bytes_accessed=int(bytes_accessed))

    # Working-set estimate; raise the scoped-VMEM limit only when needed
    # (v5e default is 16 MiB; stay comfortably under v7x's 64 MiB physical).
    vmem_est = (2 * itemsize * (Cl * t + Ch * t4 + Cout * t)
                + 4 * Cout * (t + t4)
                + 2 * itemsize * Cout * C)
    cp_kwargs = dict(dimension_semantics=("parallel", "parallel"))
    if vmem_est > (12 << 20):
        cp_kwargs["vmem_limit_bytes"] = int(min(max(2 * vmem_est, 32 << 20), 48 << 20))

    out = pl.pallas_call(
        kernel,
        out_shape=jax.ShapeDtypeStruct((B, Cout, HW2), dtype),
        grid_spec=pltpu.PrefetchScalarGridSpec(
            num_scalar_prefetch=0,
            grid=(B, n_tiles),
            in_specs=in_specs,
            out_specs=pl.BlockSpec((1, Cout, t), lambda b, i: (b, 0, i)),
            scratch_shapes=[pltpu.VMEM((Cout, t4), jnp.float32),
                            pltpu.VMEM((Cout, t), jnp.float32)],
        ),
        compiler_params=pltpu.CompilerParams(**cp_kwargs),
        cost_estimate=cost,
    )(*low_flats, high_flat, *wls, wch, e, bias)

    return out.reshape(B, Cout, H2, W2)


# --------------------------------------------------------------------------- #
# Pure-JAX reference mirroring the PyTorch forward exactly
# --------------------------------------------------------------------------- #
def fse_reference(high_features, low_features, params):
    w1, w2, wc, bc = params
    up = jnp.repeat(jnp.repeat(high_features, 2, axis=2), 2, axis=3)
    f = jnp.concatenate([up] + list(low_features), axis=1)            # [B, C, H2, W2]
    y = jnp.mean(f, axis=(2, 3))                                      # [B, C]
    h = jax.nn.relu(y @ w1.T)
    s = jax.nn.sigmoid(h @ w2.T)                                      # [B, C]
    f = f * s[:, :, None, None]
    out = jnp.einsum("bchw,oc->bohw", f, wc) + bc.reshape(1, -1, 1, 1)
    return jax.nn.relu(out)


if __name__ == "__main__":
    key = jax.random.PRNGKey(0)
    k_hi, k_l0, k_l1, k_w1, k_w2, k_wc, k_bc = jax.random.split(key, 7)

    # fSEModule config: high_feature_channel=16, low_feature_channels=48
    # (two low tensors: 32 + 16 channels) -> C = 64, reduction 16 -> mid = 4,
    # out_channel = 16.
    B, Ch, H, W = 2, 16, 8, 8
    Cl0, Cl1 = 32, 16
    C = Ch + Cl0 + Cl1
    mid = C // 16
    Cout = Ch

    high = jax.random.normal(k_hi, (B, Ch, H, W), dtype=jnp.float32)
    low0 = jax.random.normal(k_l0, (B, Cl0, 2 * H, 2 * W), dtype=jnp.float32)
    low1 = jax.random.normal(k_l1, (B, Cl1, 2 * H, 2 * W), dtype=jnp.float32)
    low_features = [low0, low1]

    # PyTorch layouts: fc[0].weight (mid,C), fc[2].weight (C,mid),
    # conv_se.weight[...,0,0] (Cout,C), conv_se.bias (Cout,)
    w1 = 0.1 * jax.random.normal(k_w1, (mid, C), dtype=jnp.float32)
    w2 = 0.1 * jax.random.normal(k_w2, (C, mid), dtype=jnp.float32)
    wc = 0.1 * jax.random.normal(k_wc, (Cout, C), dtype=jnp.float32)
    bc = 0.1 * jax.random.normal(k_bc, (Cout,), dtype=jnp.float32)
    params = (w1, w2, wc, bc)

    fwd = jax.jit(lambda h, lo, p: fse_forward(h, lo, p))
    out = jax.block_until_ready(fwd(high, low_features, params))
    ref = fse_reference(high, low_features, params)

    assert out.shape == (B, Cout, 2 * H, 2 * W), out.shape
    max_err = float(jnp.max(jnp.abs(out - ref)))
    assert jnp.allclose(out, ref, rtol=1e-4, atol=1e-4), max_err

    print("KERNEL_OK")
</pallas_src>

<mosaic_0001>
module attributes {stable_mosaic.version = 11 : i64} {
  func.func @kernel(%arg0: i32, %arg1: i32, %arg2: memref<1x32x256xf32, #tpu.memory_space<vmem>>, %arg3: memref<1x16x256xf32, #tpu.memory_space<vmem>>, %arg4: memref<1x16x64xf32, #tpu.memory_space<vmem>>, %arg5: memref<1x16x32xf32, #tpu.memory_space<vmem>>, %arg6: memref<1x16x16xf32, #tpu.memory_space<vmem>>, %arg7: memref<1x16x16xf32, #tpu.memory_space<vmem>>, %arg8: memref<8x16xf32, #tpu.memory_space<vmem>>, %arg9: memref<16x1xf32, #tpu.memory_space<vmem>>, %arg10: memref<1x16x256xf32, #tpu.memory_space<vmem>>, %arg11: memref<16x64xf32, #tpu.memory_space<vmem>>, %arg12: memref<16x256xf32, #tpu.memory_space<vmem>>) attributes {dimension_semantics = [#tpu.dimension_semantics<parallel>, #tpu.dimension_semantics<parallel>], iteration_bounds = array<i64: 2, 1>, scalar_prefetch = 0 : i64, scratch_operands = 2 : i64, tpu.core_type = #tpu.core_type<tc>, window_params = [{transform_indices = @transform_0, window_bounds = array<i64: 1, 32, 256>}, {transform_indices = @transform_1, window_bounds = array<i64: 1, 16, 256>}, {transform_indices = @transform_2, window_bounds = array<i64: 1, 16, 64>}, {transform_indices = @transform_3, window_bounds = array<i64: 1, 16, 32>}, {transform_indices = @transform_4, window_bounds = array<i64: 1, 16, 16>}, {transform_indices = @transform_5, window_bounds = array<i64: 1, 16, 16>}, {pipeline_mode = #tpu.pipeline_mode<synchronous>, transform_indices = @transform_6, window_bounds = array<i64: 8, 16>}, {pipeline_mode = #tpu.pipeline_mode<synchronous>, transform_indices = @transform_7, window_bounds = array<i64: 16, 1>}, {transform_indices = @transform_8, window_bounds = array<i64: 1, 16, 256>}]} {
    %c0 = arith.constant 0 : index
    %c0_0 = arith.constant 0 : index
    %c0_1 = arith.constant 0 : index
    %0 = vector.load %arg7[%c0, %c0_0, %c0_1] : memref<1x16x16xf32, #tpu.memory_space<vmem>>, vector<1x16x16xf32>
    %1 = vector.shape_cast %0 : vector<1x16x16xf32> to vector<16x16xf32>
    %c0_2 = arith.constant 0 : index
    %c0_3 = arith.constant 0 : index
    %c0_4 = arith.constant 0 : index
    %2 = vector.load %arg4[%c0_2, %c0_3, %c0_4] : memref<1x16x64xf32, #tpu.memory_space<vmem>>, vector<1x16x64xf32>
    %3 = vector.shape_cast %2 : vector<1x16x64xf32> to vector<16x64xf32>
    %cst = arith.constant dense<0.000000e+00> : vector<16x64xf32>
    %4 = tpu.matmul %1, %3, %cst {dimension_numbers = #tpu.dot_dimension_numbers<[1], [0], [0], [1], [0, 0, 1, 1], [], []>} : vector<16x16xf32>, vector<16x64xf32>, vector<16x64xf32> -> vector<16x64xf32>
    %c0_5 = arith.constant 0 : index
    %c0_6 = arith.constant 0 : index
    %5 = vector.load %arg11[%c0_5, %c0_6] : memref<16x64xf32, #tpu.memory_space<vmem>>, vector<16x64xf32>
    tpu.vector_store %arg11[%c0_5, %c0_6], %4 {strides = array<i32>} : memref<16x64xf32, #tpu.memory_space<vmem>>, vector<16x64xf32>,
    %c0_7 = arith.constant 0 : index
    %c0_8 = arith.constant 0 : index
    %6 = vector.load %arg11[%c0_7, %c0_8] : memref<16x64xf32, #tpu.memory_space<vmem>>, vector<16x8xf32>
    %c0_9 = arith.constant 0 : index
    %c0_10 = arith.constant 0 : index
    %7 = vector.load %arg8[%c0_9, %c0_10] : memref<8x16xf32, #tpu.memory_space<vmem>>, vector<8x16xf32>
    %cst_11 = arith.constant dense<0.000000e+00> : vector<16x16xf32>
    %8 = tpu.matmul %6, %7, %cst_11 {dimension_numbers = #tpu.dot_dimension_numbers<[1], [0], [0], [1], [0, 0, 1, 1], [], []>} : vector<16x8xf32>, vector<8x16xf32>, vector<16x16xf32> -> vector<16x16xf32>
    %c0_12 = arith.constant 0 : index
    %c0_13 = arith.constant 0 : index
    %9 = vector.load %arg12[%c0_12, %c0_13] : memref<16x256xf32, #tpu.memory_space<vmem>>, vector<16x16xf32>
    tpu.vector_store %arg12[%c0_12, %c0_13], %8 {strides = array<i32>} : memref<16x256xf32, #tpu.memory_space<vmem>>, vector<16x16xf32>,
    %c0_14 = arith.constant 0 : index
    %c16 = arith.constant 16 : index
    %10 = vector.load %arg12[%c0_14, %c16] : memref<16x256xf32, #tpu.memory_space<vmem>>, vector<16x16xf32>
    tpu.vector_store %arg12[%c0_14, %c16], %8 {strides = array<i32>} : memref<16x256xf32, #tpu.memory_space<vmem>>, vector<16x16xf32>,
    %c0_15 = arith.constant 0 : index
    %c8 = arith.constant 8 : index
    %11 = vector.load %arg11[%c0_15, %c8] : memref<16x64xf32, #tpu.memory_space<vmem>>, vector<16x8xf32>
    %c0_16 = arith.constant 0 : index
    %c0_17 = arith.constant 0 : index
    %12 = vector.load %arg8[%c0_16, %c0_17] : memref<8x16xf32, #tpu.memory_space<vmem>>, vector<8x16xf32>
    %cst_18 = arith.constant dense<0.000000e+00> : vector<16x16xf32>
    %13 = tpu.matmul %11, %12, %cst_18 {dimension_numbers = #tpu.dot_dimension_numbers<[1], [0], [0], [1], [0, 0, 1, 1], [], []>} : vector<16x8xf32>, vector<8x16xf32>, vector<16x16xf32> -> vector<16x16xf32>
    %c0_19 = arith.constant 0 : index
    %c32 = arith.constant 32 : index
    %14 = vector.load %arg12[%c0_19, %c32] : memref<16x256xf32, #tpu.memory_space<vmem>>, vector<16x16xf32>
    tpu.vector_store %arg12[%c0_19, %c32], %13 {strides = array<i32>} : memref<16x256xf32, #tpu.memory_space<vmem>>, vector<16x16xf32>,
    %c0_20 = arith.constant 0 : index
    %c48 = arith.constant 48 : index
    %15 = vector.load %arg12[%c0_20, %c48] : memref<16x256xf32, #tpu.memory_space<vmem>>, vector<16x16xf32>
    tpu.vector_store %arg12[%c0_20, %c48], %13 {strides = array<i32>} : memref<16x256xf32, #tpu.memory_space<vmem>>, vector<16x16xf32>,
    %c0_21 = arith.constant 0 : index
    %c16_22 = arith.constant 16 : index
    %16 = vector.load %arg11[%c0_21, %c16_22] : memref<16x64xf32, #tpu.memory_space<vmem>>, vector<16x8xf32>
    %c0_23 = arith.constant 0 : index
    %c0_24 = arith.constant 0 : index
    %17 = vector.load %arg8[%c0_23, %c0_24] : memref<8x16xf32, #tpu.memory_space<vmem>>, vector<8x16xf32>
    %cst_25 = arith.constant dense<0.000000e+00> : vector<16x16xf32>
    %18 = tpu.matmul %16, %17, %cst_25 {dimension_numbers = #tpu.dot_dimension_numbers<[1], [0], [0], [1], [0, 0, 1, 1], [], []>} : vector<16x8xf32>, vector<8x16xf32>, vector<16x16xf32> -> vector<16x16xf32>
    %c0_26 = arith.constant 0 : index
    %c64 = arith.constant 64 : index
    %19 = vector.load %arg12[%c0_26, %c64] : memref<16x256xf32, #tpu.memory_space<vmem>>, vector<16x16xf32>
    tpu.vector_store %arg12[%c0_26, %c64], %18 {strides = array<i32>} : memref<16x256xf32, #tpu.memory_space<vmem>>, vector<16x16xf32>,
    %c0_27 = arith.constant 0 : index
    %c80 = arith.constant 80 : index
    %20 = vector.load %arg12[%c0_27, %c80] : memref<16x256xf32, #tpu.memory_space<vmem>>, vector<16x16xf32>
    tpu.vector_store %arg12[%c0_27, %c80], %18 {strides = array<i32>} : memref<16x256xf32, #tpu.memory_space<vmem>>, vector<16x16xf32>,
    %c0_28 = arith.constant 0 : index
    %c24 = arith.constant 24 : index
    %21 = vector.load %arg11[%c0_28, %c24] : memref<16x64xf32, #tpu.memory_space<vmem>>, vector<16x8xf32>
    %c0_29 = arith.constant 0 : index
    %c0_30 = arith.constant 0 : index
    %22 = vector.load %arg8[%c0_29, %c0_30] : memref<8x16xf32, #tpu.memory_space<vmem>>, vector<8x16xf32>
    %cst_31 = arith.constant dense<0.000000e+00> : vector<16x16xf32>
    %23 = tpu.matmul %21, %22, %cst_31 {dimension_numbers = #tpu.dot_dimension_numbers<[1], [0], [0], [1], [0, 0, 1, 1], [], []>} : vector<16x8xf32>, vector<8x16xf32>, vector<16x16xf32> -> vector<16x16xf32>
    %c0_32 = arith.constant 0 : index
    %c96 = arith.constant 96 : index
    %24 = vector.load %arg12[%c0_32, %c96] : memref<16x256xf32, #tpu.memory_space<vmem>>, vector<16x16xf32>
    tpu.vector_store %arg12[%c0_32, %c96], %23 {strides = array<i32>} : memref<16x256xf32, #tpu.memory_space<vmem>>, vector<16x16xf32>,
    %c0_33 = arith.constant 0 : index
    %c112 = arith.constant 112 : index
    %25 = vector.load %arg12[%c0_33, %c112] : memref<16x256xf32, #tpu.memory_space<vmem>>, vector<16x16xf32>
    tpu.vector_store %arg12[%c0_33, %c112], %23 {strides = array<i32>} : memref<16x256xf32, #tpu.memory_space<vmem>>, vector<16x16xf32>,
    %c0_34 = arith.constant 0 : index
    %c32_35 = arith.constant 32 : index
    %26 = vector.load %arg11[%c0_34, %c32_35] : memref<16x64xf32, #tpu.memory_space<vmem>>, vector<16x8xf32>
    %c0_36 = arith.constant 0 : index
    %c0_37 = arith.constant 0 : index
    %27 = vector.load %arg8[%c0_36, %c0_37] : memref<8x16xf32, #tpu.memory_space<vmem>>, vector<8x16xf32>
    %cst_38 = arith.constant dense<0.000000e+00> : vector<16x16xf32>
    %28 = tpu.matmul %26, %27, %cst_38 {dimension_numbers = #tpu.dot_dimension_numbers<[1], [0], [0], [1], [0, 0, 1, 1], [], []>} : vector<16x8xf32>, vector<8x16xf32>, vector<16x16xf32> -> vector<16x16xf32>
    %c0_39 = arith.constant 0 : index
    %c128 = arith.constant 128 : index
    %29 = vector.load %arg12[%c0_39, %c128] : memref<16x256xf32, #tpu.memory_space<vmem>>, vector<16x16xf32>
    tpu.vector_store %arg12[%c0_39, %c128], %28 {strides = array<i32>} : memref<16x256xf32, #tpu.memory_space<vmem>>, vector<16x16xf32>,
    %c0_40 = arith.constant 0 : index
    %c144 = arith.constant 144 : index
    %30 = vector.load %arg12[%c0_40, %c144] : memref<16x256xf32, #tpu.memory_space<vmem>>, vector<16x16xf32>
    tpu.vector_store %arg12[%c0_40, %c144], %28 {strides = array<i32>} : memref<16x256xf32, #tpu.memory_space<vmem>>, vector<16x16xf32>,
    %c0_41 = arith.constant 0 : index
    %c40 = arith.constant 40 : index
    %31 = vector.load %arg11[%c0_41, %c40] : memref<16x64xf32, #tpu.memory_space<vmem>>, vector<16x8xf32>
    %c0_42 = arith.constant 0 : index
    %c0_43 = arith.constant 0 : index
    %32 = vector.load %arg8[%c0_42, %c0_43] : memref<8x16xf32, #tpu.memory_space<vmem>>, vector<8x16xf32>
    %cst_44 = arith.constant dense<0.000000e+00> : vector<16x16xf32>
    %33 = tpu.matmul %31, %32, %cst_44 {dimension_numbers = #tpu.dot_dimension_numbers<[1], [0], [0], [1], [0, 0, 1, 1], [], []>} : vector<16x8xf32>, vector<8x16xf32>, vector<16x16xf32> -> vector<16x16xf32>
    %c0_45 = arith.constant 0 : index
    %c160 = arith.constant 160 : index
    %34 = vector.load %arg12[%c0_45, %c160] : memref<16x256xf32, #tpu.memory_space<vmem>>, vector<16x16xf32>
    tpu.vector_store %arg12[%c0_45, %c160], %33 {strides = array<i32>} : memref<16x256xf32, #tpu.memory_space<vmem>>, vector<16x16xf32>,
    %c0_46 = arith.constant 0 : index
    %c176 = arith.constant 176 : index
    %35 = vector.load %arg12[%c0_46, %c176] : memref<16x256xf32, #tpu.memory_space<vmem>>, vector<16x16xf32>
    tpu.vector_store %arg12[%c0_46, %c176], %33 {strides = array<i32>} : memref<16x256xf32, #tpu.memory_space<vmem>>, vector<16x16xf32>,
    %c0_47 = arith.constant 0 : index
    %c48_48 = arith.constant 48 : index
    %36 = vector.load %arg11[%c0_47, %c48_48] : memref<16x64xf32, #tpu.memory_space<vmem>>, vector<16x8xf32>
    %c0_49 = arith.constant 0 : index
    %c0_50 = arith.constant 0 : index
    %37 = vector.load %arg8[%c0_49, %c0_50] : memref<8x16xf32, #tpu.memory_space<vmem>>, vector<8x16xf32>
    %cst_51 = arith.constant dense<0.000000e+00> : vector<16x16xf32>
    %38 = tpu.matmul %36, %37, %cst_51 {dimension_numbers = #tpu.dot_dimension_numbers<[1], [0], [0], [1], [0, 0, 1, 1], [], []>} : vector<16x8xf32>, vector<8x16xf32>, vector<16x16xf32> -> vector<16x16xf32>
    %c0_52 = arith.constant 0 : index
    %c192 = arith.constant 192 : index
    %39 = vector.load %arg12[%c0_52, %c192] : memref<16x256xf32, #tpu.memory_space<vmem>>, vector<16x16xf32>
    tpu.vector_store %arg12[%c0_52, %c192], %38 {strides = array<i32>} : memref<16x256xf32, #tpu.memory_space<vmem>>, vector<16x16xf32>,
    %c0_53 = arith.constant 0 : index
    %c208 = arith.constant 208 : index
    %40 = vector.load %arg12[%c0_53, %c208] : memref<16x256xf32, #tpu.memory_space<vmem>>, vector<16x16xf32>
    tpu.vector_store %arg12[%c0_53, %c208], %38 {strides = array<i32>} : memref<16x256xf32, #tpu.memory_space<vmem>>, vector<16x16xf32>,
    %c0_54 = arith.constant 0 : index
    %c56 = arith.constant 56 : index
    %41 = vector.load %arg11[%c0_54, %c56] : memref<16x64xf32, #tpu.memory_space<vmem>>, vector<16x8xf32>
    %c0_55 = arith.constant 0 : index
    %c0_56 = arith.constant 0 : index
    %42 = vector.load %arg8[%c0_55, %c0_56] : memref<8x16xf32, #tpu.memory_space<vmem>>, vector<8x16xf32>
    %cst_57 = arith.constant dense<0.000000e+00> : vector<16x16xf32>
    %43 = tpu.matmul %41, %42, %cst_57 {dimension_numbers = #tpu.dot_dimension_numbers<[1], [0], [0], [1], [0, 0, 1, 1], [], []>} : vector<16x8xf32>, vector<8x16xf32>, vector<16x16xf32> -> vector<16x16xf32>
    %c0_58 = arith.constant 0 : index
    %c224 = arith.constant 224 : index
    %44 = vector.load %arg12[%c0_58, %c224] : memref<16x256xf32, #tpu.memory_space<vmem>>, vector<16x16xf32>
    tpu.vector_store %arg12[%c0_58, %c224], %43 {strides = array<i32>} : memref<16x256xf32, #tpu.memory_space<vmem>>, vector<16x16xf32>,
    %c0_59 = arith.constant 0 : index
    %c240 = arith.constant 240 : index
    %45 = vector.load %arg12[%c0_59, %c240] : memref<16x256xf32, #tpu.memory_space<vmem>>, vector<16x16xf32>
    tpu.vector_store %arg12[%c0_59, %c240], %43 {strides = array<i32>} : memref<16x256xf32, #tpu.memory_space<vmem>>, vector<16x16xf32>,
    %c0_60 = arith.constant 0 : index
    %c0_61 = arith.constant 0 : index
    %c0_62 = arith.constant 0 : index
    %46 = vector.load %arg5[%c0_60, %c0_61, %c0_62] : memref<1x16x32xf32, #tpu.memory_space<vmem>>, vector<1x16x32xf32>
    %47 = vector.shape_cast %46 : vector<1x16x32xf32> to vector<16x32xf32>
    %c0_63 = arith.constant 0 : index
    %c0_64 = arith.constant 0 : index
    %c0_65 = arith.constant 0 : index
    %48 = vector.load %arg2[%c0_63, %c0_64, %c0_65] : memref<1x32x256xf32, #tpu.memory_space<vmem>>, vector<1x32x256xf32>
    %49 = vector.shape_cast %48 : vector<1x32x256xf32> to vector<32x256xf32>
    %cst_66 = arith.constant dense<0.000000e+00> : vector<16x256xf32>
    %50 = tpu.matmul %47, %49, %cst_66 {dimension_numbers = #tpu.dot_dimension_numbers<[1], [0], [0], [1], [0, 0, 1, 1], [], []>} : vector<16x32xf32>, vector<32x256xf32>, vector<16x256xf32> -> vector<16x256xf32>
    %c0_67 = arith.constant 0 : index
    %c0_68 = arith.constant 0 : index
    %c0_69 = arith.constant 0 : index
    %51 = vector.load %arg6[%c0_67, %c0_68, %c0_69] : memref<1x16x16xf32, #tpu.memory_space<vmem>>, vector<1x16x16xf32>
    %52 = vector.shape_cast %51 : vector<1x16x16xf32> to vector<16x16xf32>
    %c0_70 = arith.constant 0 : index
    %c0_71 = arith.constant 0 : index
    %c0_72 = arith.constant 0 : index
    %53 = vector.load %arg3[%c0_70, %c0_71, %c0_72] : memref<1x16x256xf32, #tpu.memory_space<vmem>>, vector<1x16x256xf32>
    %54 = vector.shape_cast %53 : vector<1x16x256xf32> to vector<16x256xf32>
    %cst_73 = arith.constant dense<0.000000e+00> : vector<16x256xf32>
    %55 = tpu.matmul %52, %54, %cst_73 {dimension_numbers = #tpu.dot_dimension_numbers<[1], [0], [0], [1], [0, 0, 1, 1], [], []>} : vector<16x16xf32>, vector<16x256xf32>, vector<16x256xf32> -> vector<16x256xf32>
    %56 = arith.addf %50, %55 : vector<16x256xf32>
    %c0_74 = arith.constant 0 : index
    %c0_75 = arith.constant 0 : index
    %57 = vector.load %arg12[%c0_74, %c0_75] : memref<16x256xf32, #tpu.memory_space<vmem>>, vector<16x256xf32>
    %58 = arith.addf %56, %57 : vector<16x256xf32>
    %c0_76 = arith.constant 0 : index
    %c0_77 = arith.constant 0 : index
    %59 = vector.load %arg9[%c0_76, %c0_77] : memref<16x1xf32, #tpu.memory_space<vmem>>, vector<16x1xf32>
    %60 = vector.broadcast %59 : vector<16x1xf32> to vector<16x256xf32>
    %61 = arith.addf %58, %60 : vector<16x256xf32>
    %cst_78 = arith.constant 0.000000e+00 : f32
    %62 = vector.broadcast %cst_78 : f32 to vector<16x256xf32>
    %63 = arith.maximumf %61, %62 : vector<16x256xf32>
    %c0_79 = arith.constant 0 : index
    %c0_80 = arith.constant 0 : index
    %c0_81 = arith.constant 0 : index
    %64 = vector.load %arg10[%c0_79, %c0_80, %c0_81] : memref<1x16x256xf32, #tpu.memory_space<vmem>>, vector<1x16x256xf32>
    %65 = vector.shape_cast %64 : vector<1x16x256xf32> to vector<16x256xf32>
    %66 = vector.shape_cast %63 : vector<16x256xf32> to vector<1x16x256xf32>
    tpu.vector_store %arg10[%c0_79, %c0_80, %c0_81], %66 {strides = array<i32>} : memref<1x16x256xf32, #tpu.memory_space<vmem>>, vector<1x16x256xf32>,
    return
  }
  func.func @transform_0(%arg0: i32, %arg1: i32) -> (i32, i32, i32) {
    %c0_i32 = arith.constant 0 : i32
    %c0_i32_0 = arith.constant 0 : i32
    return %arg0, %c0_i32, %arg1 : i32, i32, i32
  }
  func.func @transform_1(%arg0: i32, %arg1: i32) -> (i32, i32, i32) {
    %c0_i32 = arith.constant 0 : i32
    %c0_i32_0 = arith.constant 0 : i32
    return %arg0, %c0_i32, %arg1 : i32, i32, i32
  }
  func.func @transform_2(%arg0: i32, %arg1: i32) -> (i32, i32, i32) {
    %c0_i32 = arith.constant 0 : i32
    %c0_i32_0 = arith.constant 0 : i32
    return %arg0, %c0_i32, %arg1 : i32, i32, i32
  }
  func.func @transform_3(%arg0: i32, %arg1: i32) -> (i32, i32, i32) {
    %c0_i32 = arith.constant 0 : i32
    %c0_i32_0 = arith.constant 0 : i32
    %c0_i32_1 = arith.constant 0 : i32
    return %arg0, %c0_i32, %c0_i32_0 : i32, i32, i32
  }
  func.func @transform_4(%arg0: i32, %arg1: i32) -> (i32, i32, i32) {
    %c0_i32 = arith.constant 0 : i32
    %c0_i32_0 = arith.constant 0 : i32
    %c0_i32_1 = arith.constant 0 : i32
    return %arg0, %c0_i32, %c0_i32_0 : i32, i32, i32
  }
  func.func @transform_5(%arg0: i32, %arg1: i32) -> (i32, i32, i32) {
    %c0_i32 = arith.constant 0 : i32
    %c0_i32_0 = arith.constant 0 : i32
    %c0_i32_1 = arith.constant 0 : i32
    return %arg0, %c0_i32, %c0_i32_0 : i32, i32, i32
  }
  func.func @transform_6(%arg0: i32, %arg1: i32) -> (i32, i32) {
    %c0_i32 = arith.constant 0 : i32
    %c0_i32_0 = arith.constant 0 : i32
    %c0_i32_1 = arith.constant 0 : i32
    return %c0_i32, %c0_i32_0 : i32, i32
  }
  func.func @transform_7(%arg0: i32, %arg1: i32) -> (i32, i32) {
    %c0_i32 = arith.constant 0 : i32
    %c0_i32_0 = arith.constant 0 : i32
    %c0_i32_1 = arith.constant 0 : i32
    return %c0_i32, %c0_i32_0 : i32, i32
  }
  func.func @transform_8(%arg0: i32, %arg1: i32) -> (i32, i32, i32) {
    %c0_i32 = arith.constant 0 : i32
    %c0_i32_0 = arith.constant 0 : i32
    return %arg0, %c0_i32, %arg1 : i32, i32, i32
  }
}

</mosaic_0001>

<bundles_post_ra>
// kernel: _lambda_.1
= control target key start
LH: loop header
LB: loop body
LE: loop exit
PB: predicated region body
PF: predicated region fallthrough
CT: control target
= control target key end

     0   :  { %s2041_s27 = smov 0   ;;  %s2043_s28 = smov 0   ;;  %s2235_s0 = inlined_call_operand.vmem [shape: f32[2,32,256], index: 0, kind: input, shape index: {}]   ;;  %s2236_s1 = inlined_call_operand.vmem [shape: f32[2,16,256], index: 1, kind: input, shape index: {}]   ;;  %s2237_s2 = inlined_call_operand.vmem [shape: f32[2,16,64], index: 2, kind: input, shape index: {}]   ;;  %s2238_s3 = inlined_call_operand.vmem [shape: f32[2,16,32], index: 3, kind: input, shape index: {}]   ;;  %s2239_s4 = inlined_call_operand.vmem [shape: f32[2,16,16], index: 4, kind: input, shape index: {}]   ;;  %s2240_s5 = inlined_call_operand.vmem [shape: f32[2,16,16], index: 5, kind: input, shape index: {}]   ;;  %s2241_s6 = inlined_call_operand.vmem [shape: f32[8,16], index: 6, kind: input, shape index: {}]   ;;  %s2242_s7 = inlined_call_operand.vmem [shape: f32[16,1], index: 7, kind: input, shape index: {}]   ;;  %s2243_s8 = inlined_call_operand.vmem [shape: f32[2,16,256], index: 8, kind: output, shape index: {}]  }
   0x1   :  { %s2045_s29 = smov 0  }
   0x2 LB: > { %s30_s30 = sadd.s32 1, %s1977_s28  ;;  %p1779_p0 = scmp.ge.s32.totalorder %s1981_s29, 1  ;;  %s1981_s29 = sphi %s2045_s29, %s18_s29   ;;  %s1977_s28 = sphi %s2043_s28, %s2245_s28   ;;  %s1973_s27 = sphi %s2041_s27, %s2244_s27  }
   0x3   : > { %p32_p1 = scmp.ge.s32.totalorder %s30_s30, 2  ;;  %p345_p2 = scmp.lt.s32.totalorder %s1981_s29, 3 }
   0x5   : > { %s2247_s30 = smov (%p32_p1, %s30_s30), 0  ;;  %p346_p3 = pnand %p1779_p0, %p345_p2 }
   0x6   : > { %p420_p4 = scmp.lt.s32.totalorder (!%p346_p3), %s1973_s27, 1  ;;  %vm476_vm0 = vcmask (!%p346_p3), 130048   ;;  %v2077_v5 = vld [vmem:[%s2241_s6] sm:$0xff] (!%p346_p3)  ;;  %vm558_vm1 = vcmask (!%p346_p3), 523264   ;;  %vm564_vm2 = vcmask (!%p346_p3), 64512   ;;  %s1983_s18 = smov (!%p346_p3), 112  }
   0x7   : > { %349 = sbr.rel (%p346_p3) target bundleno = 762 (0x2fa), region = 52  ;;  %1870 = vmatprep.subr.mxu0 (!%p346_p3), %v2077_v5  ;;  %s1984_s19 = smov (!%p346_p3), 120   ;;  %v1990_v35 = vmov (!%p346_p3), 0.0   ;;  %vm1500_vm3 = vcmask (!%p346_p3), 261120   ;;  %v1992_v49 = vmov (!%p346_p3), 0   ;;  %vm656_vm4 = vcmask (!%p346_p3), 261248  }
   0x8   : > { %1871 = vmatpush3.msra.mxu0 (!%p346_p3), %v2077_v5  ;;  %s1985_s20 = smov (!%p346_p3), 104   ;;  %s1986_s21 = smov (!%p346_p3), 96   ;;  %1958 = vset.pattern.permute.xlu1 (!%p346_p3), %v1992_v49  ;;  %vm755_vm5 = vcmask (!%p346_p3), 392448   ;;  %vm764_vm6 = vcmask (!%p346_p3), 523648   ;;  %vm863_vm7 = vcmask (!%p346_p3), 654848   ;;  %vm872_vm8 = vcmask (!%p346_p3), 786048  }
   0x9   : > { %1880 = vmatprep.subr.mxu0 (!%p346_p3), %v2077_v5  ;;  %s1987_s22 = smov (!%p346_p3), 88   ;;  %s1988_s23 = smov (!%p346_p3), 80   ;;  %1957 = vset.pattern.permute.xlu0 (!%p346_p3), %v1992_v49  ;;  %vm971_vm9 = vcmask (!%p346_p3), 917248   ;;  %vm980_vm10 = vcmask (!%p346_p3), 1048448  }
   0xa   : > { %s1989_s24 = smov (!%p346_p3), 72   ;;  %s1991_s26 = smov (!%p346_p3), 16  }
   0xb   : > { %s1994_s10 = smov (!%p346_p3), 48  }
   0xe   : > { %s2249_s27 = smov (!%p420_p4, %s1973_s27), 1 }
   0xf   : > { %s2062_s9 = sshll.u32 %s2249_s27, 4  ;;  %s1819_s25 = sshll.u32 %s2249_s27, 5 }
  0x10   : > { %s446_s12 = scalar_lea.vmem %s2237_s2, %s2062_s9  ;;  %s461_s15 = scalar_lea.vmem %s2240_s5, %s2062_s9 }
  0x11   : > { %v474_v0 = vld [vmem:[%s446_s12] sm:$0xff]  ;;  %v475_v1 = vld [vmem:[%s446_s12 + $0x8] sm:$0xff]  ;;  %s437_s11 = scalar_lea.vmem %s2236_s1, %s1819_s25  ;;  %s1818_s12 = sshll.u32 %s2249_s27, 6 }
  0x12   : > { %v1900_v2 = vpack.c.bf16 %v475_v1, %v474_v0  ;;  %v472_v3 = vld [vmem:[%s461_s15] sm:$0xff]  ;;  %v473_v4 = vld [vmem:[%s461_s15 + $0x8] sm:$0xff]  ;;  %v1416_v19 = vld [vmem:[%s437_s11 + $0x18] sm:$0xff]  ;;  %s2114_s15 = scalar_lea.vmem %s2235_s0, %s1818_s12 }
  0x13   : > { %1857 = vmatprep.mubr.msk.f32.mxu1 %vm476_vm0, %v472_v3  ;;  %v1414_v18 = vld [vmem:[%s437_s11 + $0x8] sm:$0xff]  ;;  %v1413_v23 = vld [vmem:[%s437_s11] sm:$0xff]  ;;  %v1415_v24 = vld [vmem:[%s437_s11 + $0x10] sm:$0xff]  ;;  %s1995_s11 = smov 64  }
  0x14   : > { %1901 = vmatprep.subr.bf16.mxu1 %v1900_v2  ;;  %v1904_v22 = vpack.c.bf16 %v1416_v19, %v1414_v18  ;;  %v1404_v25 = vld [vmem:[%s2114_s15 + $0x8] sm:$0xff]  ;;  %v1406_v26 = vld [vmem:[%s2114_s15 + $0x18] sm:$0xff]  ;;  %v1906_v27 = vpack.c.bf16 %v1415_v24, %v1413_v23  ;;  %v1403_v31 = vld [vmem:[%s2114_s15] sm:$0xff] }
  0x15   : > { %1903 = vmatpush3.bf16.msra.mxu1 %v1900_v2  ;;  %v1908_v30 = vpack.c.bf16 %v1406_v26, %v1404_v25  ;;  %v1405_v32 = vld [vmem:[%s2114_s15 + $0x10] sm:$0xff]  ;;  %v1408_v33 = vld [vmem:[%s2114_s15 + $0x28] sm:$0xff]  ;;  %v1410_v34 = vld [vmem:[%s2114_s15 + $0x38] sm:$0xff] }
  0x16   : > { %1860 = vmatprep.subr.mxu1 %v2077_v5  ;;  %v1910_v37 = vpack.c.bf16 %v1405_v32, %v1403_v31  ;;  %v1912_v40 = vpack.c.bf16 %v1410_v34, %v1408_v33  ;;  %v1407_v41 = vld [vmem:[%s2114_s15 + $0x20] sm:$0xff]  ;;  %v1409_v42 = vld [vmem:[%s2114_s15 + $0x30] sm:$0xff] }
  0x17   : > { %v1914_v44 = vpack.c.bf16 %v1409_v42, %v1407_v41 }
  0x18   : > { %1858 = vmatmul.mubr.msk.f32.vlgmr.msra.gmra.mrb[0].mxu1 %vm476_vm0, %v473_v4 }
  0x19   : > { %1861 = vmatpush3.msra.mxu1 %v2077_v5 }
  0x1a   : > { %1865 = vmatprep.subr.mxu1 %v2077_v5 }
  0xeb   : > { %v1859_v6 = vpop.f32.mrb[0].mxu1 }
  0xec   : > { %560 = vst.msk [vmem:[#allocation2 + $0x8] sm:$0xff] %vm558_vm1, %v1859_v6  ;;  %v549_v7 = vpop.f32.mrb[1].mxu1  ;;  %v1593_v6 = vld [vmem:[%s2242_s7 + $0x8] sm:$0xff] }
  0xed   : > { %559 = vst.msk [vmem:[#allocation2] sm:$0xff] %vm558_vm1, %v549_v7  ;;  %v1592_v7 = vld [vmem:[%s2242_s7] sm:$0xff] }
  0xf3   : > { %v768_v8 = vld [vmem:[#allocation2 + $0x8] sm:$0xff] }
  0xf4   : > { %774 = vrot.lane.b32.xlu1 %v768_v8, %s1983_s18  ;;  %666 = vrot.lane.b32.xlu0 %v768_v8, %s1984_s19  ;;  %v561_v9 = vld [vmem:[#allocation2] sm:$0xff] }
  0xf5   : > { %1862 = vmatprep.mubr.msk.f32.mxu1 %vm564_vm2, %v561_v9 }
  0xf6   : > { %1863 = vmatmul.mubr.msk.f32.vlgmr.msra.gmra.mrb[2].mxu1 %vm564_vm2, %v768_v8 }
  0xf7   : > { %1866 = vmatpush3.msra.mxu1 %v2077_v5 }
  0xf8   : > { %882 = vrot.lane.b32.xlu1 %v768_v8, %s1985_s20  ;;  %664 = vrot.lane.b32.xlu0 %v561_v9, %s1984_s19  ;;  %s456_s19 = scalar_lea.vmem %s2239_s4, %s2062_s9 }
  0xf9   : > { %1875 = vmatprep.subr.mxu1 %v2077_v5  ;;  %v1411_v36 = vld [vmem:[%s456_s19] sm:$0xff]  ;;  %v1412_v43 = vld [vmem:[%s456_s19 + $0x8] sm:$0xff] }
  0xfc   : > { %990 = vrot.lane.b32.xlu1 %v768_v8, %s1986_s21  ;;  %880 = vrot.lane.b32.xlu0 %v561_v9, %s1985_s20 }
 0x100   : > { %772 = vrot.lane.b32.xlu1 %v561_v9, %s1983_s18  ;;  %988 = vrot.lane.b32.xlu0 %v561_v9, %s1986_s21 }
 0x104   : > { %1090 = vrot.lane.b32.xlu1 %v768_v8, %s1987_s22  ;;  %1088 = vrot.lane.b32.xlu0 %v561_v9, %s1987_s22 }
 0x108   : > { %1196 = vrot.lane.b32.xlu1 %v768_v8, %s1988_s23  ;;  %1194 = vrot.lane.b32.xlu0 %v561_v9, %s1988_s23 }
 0x10c   : > { %1302 = vrot.lane.b32.xlu1 %v768_v8, %s1989_s24  ;;  %1300 = vrot.lane.b32.xlu0 %v561_v9, %s1989_s24  ;;  %s451_s24 = scalar_lea.vmem %s2238_s3, %s2062_s9  ;;  %s1993_s9 = smov 32  }
 0x10d   : > { %v1401_v45 = vld [vmem:[%s451_s24] sm:$0xff]  ;;  %v1402_v46 = vld [vmem:[%s451_s24 + $0x8] sm:$0xff] }
 0x166   : > { %v775_v10 = vpop.permute.xlu1 %774  ;;  %v667_v11 = vpop.permute.xlu0 %666 }
 0x16a   : > { %v883_v12 = vpop.permute.xlu1 %882  ;;  %v665_v13 = vpop.permute.xlu0 %664 }
 0x16b   : > { %1867 = vmatprep.mubr.msk.f32.mxu1 %vm564_vm2, %v665_v13 }
 0x16c   : > { %1868 = vmatmul.mubr.msk.f32.vlgmr.msra.gmra.mrb[4].mxu1 %vm564_vm2, %v667_v11 }
 0x16d   : > { %1876 = vmatpush3.msra.mxu1 %v2077_v5 }
 0x16e   : > { %v991_v14 = vpop.permute.xlu1 %990  ;;  %v881_v15 = vpop.permute.xlu0 %880  ;;  %1885 = vmatprep.subr.mxu1 %v2077_v5 }
 0x16f   : > { %1877 = vmatprep.mubr.msk.f32.mxu1 %vm564_vm2, %v881_v15 }
 0x170   : > { %1878 = vmatmul.mubr.msk.f32.vlgmr.msra.gmra.mrb[6].mxu1 %vm564_vm2, %v883_v12 }
 0x171   : > { %1886 = vmatpush3.msra.mxu1 %v2077_v5 }
 0x172   : > { %v773_v16 = vpop.permute.xlu1 %772  ;;  %v989_v17 = vpop.permute.xlu0 %988  ;;  %1895 = vmatprep.subr.mxu1 %v2077_v5 }
 0x173   : > { %1872 = vmatprep.mubr.msk.f32.mxu0 %vm564_vm2, %v773_v16 }
 0x174   : > { %1873 = vmatmul.mubr.msk.f32.vlgmr.msra.gmra.mrb[0].mxu0 %vm564_vm2, %v775_v10 }
 0x175   : > { %1882 = vmatprep.mubr.msk.f32.mxu0 %vm564_vm2, %v989_v17  ;;  %1881 = vmatpush3.msra.mxu0 %v2077_v5 }
 0x176   : > { %v1091_v20 = vpop.permute.xlu1 %1090  ;;  %v1089_v21 = vpop.permute.xlu0 %1088  ;;  %1890 = vmatprep.subr.mxu0 %v2077_v5 }
 0x177   : > { %1887 = vmatprep.mubr.msk.f32.mxu1 %vm564_vm2, %v1089_v21 }
 0x178   : > { %1883 = vmatmul.mubr.msk.f32.vlgmr.msra.gmra.mrb[2].mxu0 %vm564_vm2, %v991_v14  ;;  %1888 = vmatmul.mubr.msk.f32.vlgmr.msra.gmra.mrb[8].mxu1 %vm564_vm2, %v1091_v20 }
 0x179   : > { %1891 = vmatpush3.msra.mxu0 %v2077_v5  ;;  %1896 = vmatpush3.msra.mxu1 %v2077_v5 }
 0x17a   : > { %v1197_v28 = vpop.permute.xlu1 %1196  ;;  %v1195_v29 = vpop.permute.xlu0 %1194  ;;  %1905 = vmatprep.subr.bf16.mxu0 %v1904_v22 }
 0x17b   : > { %1892 = vmatprep.mubr.msk.f32.mxu0 %vm564_vm2, %v1195_v29 }
 0x17c   : > { %1893 = vmatmul.mubr.msk.f32.vlgmr.msra.gmra.mrb[4].mxu0 %vm564_vm2, %v1197_v28 }
 0x17d   : > { %1907 = vmatpush1.bf16.msra.mxu0 %v1906_v27  ;;  %1487 = vmatprep.mubr.f32.mxu0 %v1990_v35 }
 0x17e   : > { %v1303_v38 = vpop.permute.xlu1 %1302  ;;  %v1301_v39 = vpop.permute.xlu0 %1300  ;;  %1909 = vmatprep.subr.bf16.mxu0 %v1908_v30 }
 0x17f   : > { %1897 = vmatprep.mubr.msk.f32.mxu1 %vm564_vm2, %v1301_v39 }
 0x180   : > { %1898 = vmatmul.mubr.msk.f32.vlgmr.msra.gmra.mrb[10].mxu1 %vm564_vm2, %v1303_v38  ;;  %1812 = vmatmul.mubr.msk.f32.vlgmr.msra.gmra.mrb[6].mxu0 %vm476_vm0, %v1411_v36 }
 0x181   : > { %1911 = vmatpush1.bf16.msra.mxu0 %v1910_v37  ;;  %1493 = vmatprep.mubr.f32.mxu0 %v1990_v35 }
 0x182   : > { %1913 = vmatprep.subr.bf16.mxu0 %v1912_v40 }
 0x184   : > { %1813 = vmatmul.mubr.msk.f32.gmra.mrb[8].mxu0 %vm476_vm0, %v1412_v43 }
 0x185   : > { %1915 = vmatpush1.bf16.msra.mxu0 %v1914_v44  ;;  %1571 = vmatprep.mubr.f32.mxu0 %v1990_v35 }
 0x188   : > { %1814 = vmatmul.mubr.msk.f32.vlgmr.msra.gmra.mrb[6].mxu0 %vm1500_vm3, %v1401_v45 }
 0x189   : > { %1577 = vmatprep.mubr.f32.mxu0 %v1990_v35 }
 0x18c   : > { %1815 = vmatmul.mubr.msk.f32.gmra.mrb[8].mxu0 %vm1500_vm3, %v1402_v46 }
 0x1c9   : > { %v1864_v47 = vpop.f32.mrb[2].mxu1 }
 0x1ca   : > { %647 = vst.msk [vmem:[#allocation3 + $0x10] sm:$0xff] %vm476_vm0, %v1864_v47  ;;  %652 = vrot.lane.b32.xlu1 %v1864_v47, %s1991_s26  ;;  %v637_v48 = vpop.f32.mrb[3].mxu1 }
 0x1cb   : > { %646 = vst.msk [vmem:[#allocation3] sm:$0xff] %vm476_vm0, %v637_v48  ;;  %650 = vrot.lane.b32.xlu0 %v637_v48, %s1991_s26 }
 0x23c   : > { %v653_v50 = vpop.permute.xlu1 %652 }
 0x23d   : > { %658 = vst.msk [vmem:[#allocation3 + $0x10] sm:$0xff] %vm656_vm4, %v653_v50  ;;  %v651_v51 = vpop.permute.xlu0 %650 }
 0x23e   : > { %657 = vst.msk [vmem:[#allocation3] sm:$0xff] %vm656_vm4, %v651_v51 }
 0x23f   : > { %v1869_v52 = vpop.f32.mrb[4].mxu1 }
 0x240   : > { %751 = vrot.lane.b32.xlu1 %v1869_v52, %s1993_s9  ;;  %v738_v53 = vpop.f32.mrb[5].mxu1 }
 0x241   : > { %749 = vrot.lane.b32.xlu0 %v738_v53, %s1993_s9 }
 0x243   : > { %v1879_v54 = vpop.f32.mrb[6].mxu1 }
 0x244   : > { %760 = vrot.lane.b32.xlu1 %v1869_v52, %s1994_s10  ;;  %v954_v55 = vpop.f32.mrb[7].mxu1 }
 0x245   : > { %758 = vrot.lane.b32.xlu0 %v738_v53, %s1994_s10 }
 0x247   : > { %v1874_v56 = vpop.f32.mrb[0].mxu0 }
 0x248   : > { %v846_v57 = vpop.f32.mrb[1].mxu0  ;;  %859 = vrot.lane.b32.xlu1 %v1874_v56, %s1995_s11 }
 0x249   : > { %857 = vrot.lane.b32.xlu0 %v846_v57, %s1995_s11 }
 0x24b   : > { %v1884_v58 = vpop.f32.mrb[2].mxu0  ;;  %v1889_v59 = vpop.f32.mrb[8].mxu1 }
 0x24c   : > { %1072 = vst.msk [vmem:[#allocation3 + $0x18] sm:$0xff] %vm476_vm0, %v1884_v58  ;;  %v1062_v60 = vpop.f32.mrb[3].mxu0  ;;  %868 = vrot.lane.b32.xlu1 %v1874_v56, %s1988_s23  ;;  %v1162_v61 = vpop.f32.mrb[9].mxu1 }
 0x24d   : > { %1071 = vst.msk [vmem:[#allocation3 + $0x8] sm:$0xff] %vm476_vm0, %v1062_v60  ;;  %866 = vrot.lane.b32.xlu0 %v846_v57, %s1988_s23 }
 0x24f   : > { %v1894_v62 = vpop.f32.mrb[4].mxu0 }
 0x250   : > { %v1268_v63 = vpop.f32.mrb[5].mxu0  ;;  %1077 = vrot.lane.b32.xlu1 %v1884_v58, %s1991_s26 }
 0x251   : > { %1075 = vrot.lane.b32.xlu0 %v1062_v60, %s1991_s26 }
 0x253   : > { %v1899_v0 = vpop.f32.mrb[10].mxu1 }
 0x254   : > { %967 = vrot.lane.b32.xlu1 %v1879_v54, %s1986_s21  ;;  %v1374_v1 = vpop.f32.mrb[11].mxu1 }
 0x255   : > { %965 = vrot.lane.b32.xlu0 %v954_v55, %s1986_s21 }
 0x258   : > { %976 = vrot.lane.b32.xlu1 %v1879_v54, %s1983_s18 }
 0x259   : > { %974 = vrot.lane.b32.xlu0 %v954_v55, %s1983_s18 }
 0x25b   : > { %v2167_v2 = vpop.f32.mrb[6].mxu0 }
 0x25c   : > { %1175 = vrot.lane.b32.xlu1 %v1889_v59, %s1993_s9  ;;  %v2170_v3 = vpop.f32.mrb[7].mxu0 }
 0x25d   : > { %1173 = vrot.lane.b32.xlu0 %v1162_v61, %s1993_s9 }
 0x25f   : > { %v2173_v4 = vpop.f32.mrb[8].mxu0 }
 0x260   : > { %1183 = vrot.lane.b32.xlu1 %v1889_v59, %s1994_s10  ;;  %v2177_v5 = vpop.f32.mrb[9].mxu0 }
 0x261   : > { %1181 = vrot.lane.b32.xlu0 %v1162_v61, %s1994_s10 }
 0x264   : > { %1281 = vrot.lane.b32.xlu1 %v1894_v62, %s1995_s11 }
 0x265   : > { %1279 = vrot.lane.b32.xlu0 %v1268_v63, %s1995_s11 }
 0x268   : > { %1289 = vrot.lane.b32.xlu1 %v1894_v62, %s1988_s23 }
 0x269   : > { %1287 = vrot.lane.b32.xlu0 %v1268_v63, %s1988_s23  ;;  %s470_s23 = scalar_lea.vmem %s2243_s8, %s1819_s25 }
 0x26c   : > { %1387 = vrot.lane.b32.xlu1 %v1899_v0, %s1986_s21 }
 0x26d   : > { %1385 = vrot.lane.b32.xlu0 %v1374_v1, %s1986_s21 }
 0x270   : > { %1395 = vrot.lane.b32.xlu1 %v1899_v0, %s1983_s18 }
 0x271   : > { %1393 = vrot.lane.b32.xlu0 %v1374_v1, %s1983_s18 }
 0x274   : > { %1601 = vperm.xlu1 %1958, %v1593_v6  }
 0x275   : > { %1596 = vperm.xlu0 %1957, %v1592_v7  }
 0x2b2   : > { %v752_v8 = vpop.permute.xlu1 %751 }
 0x2b3   : > { %757 = vst.msk [vmem:[#allocation3 + $0x10] sm:$0xff] %vm755_vm5, %v752_v8  ;;  %v750_v9 = vpop.permute.xlu0 %749 }
 0x2b4   : > { %756 = vst.msk [vmem:[#allocation3] sm:$0xff] %vm755_vm5, %v750_v9 }
 0x2b6   : > { %v761_v10 = vpop.permute.xlu1 %760 }
 0x2b7   : > { %766 = vst.msk [vmem:[#allocation3 + $0x10] sm:$0xff] %vm764_vm6, %v761_v10  ;;  %v759_v11 = vpop.permute.xlu0 %758 }
 0x2b8   : > { %765 = vst.msk [vmem:[#allocation3] sm:$0xff] %vm764_vm6, %v759_v11 }
 0x2ba   : > { %v860_v12 = vpop.permute.xlu1 %859 }
 0x2bb   : > { %865 = vst.msk [vmem:[#allocation3 + $0x10] sm:$0xff] %vm863_vm7, %v860_v12  ;;  %v858_v13 = vpop.permute.xlu0 %857 }
 0x2bc   : > { %864 = vst.msk [vmem:[#allocation3] sm:$0xff] %vm863_vm7, %v858_v13 }
 0x2be   : > { %v869_v14 = vpop.permute.xlu1 %868 }
 0x2bf   : > { %874 = vst.msk [vmem:[#allocation3 + $0x10] sm:$0xff] %vm872_vm8, %v869_v14  ;;  %v867_v15 = vpop.permute.xlu0 %866 }
 0x2c0   : > { %873 = vst.msk [vmem:[#allocation3] sm:$0xff] %vm872_vm8, %v867_v15 }
 0x2c2   : > { %v1078_v16 = vpop.permute.xlu1 %1077 }
 0x2c3   : > { %1082 = vst.msk [vmem:[#allocation3 + $0x18] sm:$0xff] %vm656_vm4, %v1078_v16  ;;  %v1076_v17 = vpop.permute.xlu0 %1075 }
 0x2c4   : > { %1081 = vst.msk [vmem:[#allocation3 + $0x8] sm:$0xff] %vm656_vm4, %v1076_v17 }
 0x2c6   : > { %v968_v18 = vpop.permute.xlu1 %967 }
 0x2c7   : > { %973 = vst.msk [vmem:[#allocation3 + $0x10] sm:$0xff] %vm971_vm9, %v968_v18  ;;  %v966_v19 = vpop.permute.xlu0 %965 }
 0x2c8   : > { %972 = vst.msk [vmem:[#allocation3] sm:$0xff] %vm971_vm9, %v966_v19 }
 0x2ca   : > { %v977_v20 = vpop.permute.xlu1 %976 }
 0x2cb   : > { %982 = vst.msk [vmem:[#allocation3 + $0x10] sm:$0xff] %vm980_vm10, %v977_v20  ;;  %v975_v21 = vpop.permute.xlu0 %974 }
 0x2cc   : > { %981 = vst.msk [vmem:[#allocation3] sm:$0xff] %vm980_vm10, %v975_v21 }
 0x2ce   : > { %v1176_v22 = vpop.permute.xlu1 %1175 }
 0x2cf   : > { %1180 = vst.msk [vmem:[#allocation3 + $0x18] sm:$0xff] %vm755_vm5, %v1176_v22  ;;  %v1174_v23 = vpop.permute.xlu0 %1173 }
 0x2d0   : > { %1179 = vst.msk [vmem:[#allocation3 + $0x8] sm:$0xff] %vm755_vm5, %v1174_v23 }
 0x2d2   : > { %v1184_v24 = vpop.permute.xlu1 %1183  ;;  %v1586_v34 = vld [vmem:[#allocation3 + $0x10] sm:$0xff] }
 0x2d3   : > { %1188 = vst.msk [vmem:[#allocation3 + $0x18] sm:$0xff] %vm764_vm6, %v1184_v24  ;;  %v1182_v25 = vpop.permute.xlu0 %1181  ;;  %v1584_v36 = vld [vmem:[#allocation3] sm:$0xff]  ;;  %v1590_v38 = vadd.f32 %v1586_v34, %v2173_v4 }
 0x2d4   : > { %1187 = vst.msk [vmem:[#allocation3 + $0x8] sm:$0xff] %vm764_vm6, %v1182_v25  ;;  %v1588_v40 = vadd.f32 %v1584_v36, %v2167_v2 }
 0x2d6   : > { %v1282_v26 = vpop.permute.xlu1 %1281 }
 0x2d7   : > { %1286 = vst.msk [vmem:[#allocation3 + $0x18] sm:$0xff] %vm863_vm7, %v1282_v26  ;;  %v1280_v27 = vpop.permute.xlu0 %1279 }
 0x2d8   : > { %1285 = vst.msk [vmem:[#allocation3 + $0x8] sm:$0xff] %vm863_vm7, %v1280_v27 }
 0x2da   : > { %v1290_v28 = vpop.permute.xlu1 %1289 }
 0x2db   : > { %1294 = vst.msk [vmem:[#allocation3 + $0x18] sm:$0xff] %vm872_vm8, %v1290_v28  ;;  %v1288_v29 = vpop.permute.xlu0 %1287 }
 0x2dc   : > { %1293 = vst.msk [vmem:[#allocation3 + $0x8] sm:$0xff] %vm872_vm8, %v1288_v29 }
 0x2de   : > { %v1388_v30 = vpop.permute.xlu1 %1387 }
 0x2df   : > { %1392 = vst.msk [vmem:[#allocation3 + $0x18] sm:$0xff] %vm971_vm9, %v1388_v30  ;;  %v1386_v31 = vpop.permute.xlu0 %1385 }
 0x2e0   : > { %1391 = vst.msk [vmem:[#allocation3 + $0x8] sm:$0xff] %vm971_vm9, %v1386_v31 }
 0x2e2   : > { %v1396_v32 = vpop.permute.xlu1 %1395 }
 0x2e3   : > { %1400 = vst.msk [vmem:[#allocation3 + $0x18] sm:$0xff] %vm980_vm10, %v1396_v32  ;;  %v1394_v33 = vpop.permute.xlu0 %1393 }
 0x2e4   : > { %1399 = vst.msk [vmem:[#allocation3 + $0x8] sm:$0xff] %vm980_vm10, %v1394_v33 }
 0x2ea   : > { %v1587_v35 = vld [vmem:[#allocation3 + $0x18] sm:$0xff] }
 0x2eb   : > { %v1585_v37 = vld [vmem:[#allocation3 + $0x8] sm:$0xff]  ;;  %v1591_v39 = vadd.f32 %v1587_v35, %v2177_v5 }
 0x2ec   : > { %v1589_v42 = vadd.f32 %v1585_v37, %v2170_v3 }
 0x2f3   : > { %v1602_v41 = vpop.permute.xlu1 %1601 }
 0x2f4   : > { %v1606_v43 = vadd.f32 %v1602_v41, %v1590_v38  ;;  %v1607_v44 = vadd.f32 %v1602_v41, %v1591_v39  ;;  %v1597_v45 = vpop.permute.xlu0 %1596 }
 0x2f5   : > { %v1604_v46 = vadd.f32 %v1597_v45, %v1588_v40  ;;  %v1605_v47 = vadd.f32 %v1597_v45, %v1589_v42 }
 0x2f6   : > { %v1610_v48 = vmax.f32 %v1606_v43, 0.0  ;;  %v1611_v49 = vmax.f32 %v1607_v44, 0.0 }
 0x2f7   : > { %v1608_v50 = vmax.f32 %v1604_v46, 0.0  ;;  %v1609_v51 = vmax.f32 %v1605_v47, 0.0 }
 0x2f8   : > { %1614 = vst [vmem:[%s470_s23 + $0x10] sm:$0xff] %v1610_v48  ;;  %1615 = vst [vmem:[%s470_s23 + $0x18] sm:$0xff] %v1611_v49 }
 0x2f9   : > { %1612 = vst [vmem:[%s470_s23] sm:$0xff] %v1608_v50  ;;  %1613 = vst [vmem:[%s470_s23 + $0x8] sm:$0xff] %v1609_v51 }
 0x2fa PF: > { %s18_s29 = sadd.s32 1, %s1981_s29   ;;  %s2244_s27 = smov %s1977_s28 }
 0x2fb   : > { %p15_p5 = scmp.ge.s32.totalorder %s18_s29, 4   ;;  %s2245_s28 = smov %s2247_s30 }
 0x2fd   :  { %17 = sbr.rel (!%p15_p5) target bundleno = 2 (0x2), region = 97 }

</bundles_post_ra>
